<compile_context>
chip_gen: v7x
topology: tpu7x:2x2x1
jax: 0.10.0
libtpu: 0.0.40
codegen_flags: <defaults>
</compile_context>

<pallas_src>
import functools

import jax
import jax.numpy as jnp
from jax.experimental import pallas as pl
from jax.experimental.pallas import tpu as pltpu


def _round_up(x, m):
    return (x + m - 1) // m * m


def _sublane_align(dtype):
    # Native sublane packing: (8,128) f32, (16,128) bf16, (32,128) int8/fp8.
    return max(8, 32 // jnp.dtype(dtype).itemsize)


# ---------------------------------------------------------------------------
# Standalone forward: emb_weight[:N]  (single HBM->HBM DMA, no VMEM staging)
# ---------------------------------------------------------------------------

def _copy_prefix_kernel(emb_ref, o_ref, sem, *, chunks):
    # emb_ref / o_ref are raw HBM refs (memory_space=pl.ANY). Each grid program
    # copies exactly one statically-sized row chunk [start, start+size) — never
    # past seq_len (manual DMA has no OOB check).
    i = pl.program_id(0)
    for c, (start, size) in enumerate(chunks):
        @pl.when(i == c)
        def _(start=start, size=size):
            cp = pltpu.make_async_copy(
                emb_ref.at[pl.ds(start, size)],
                o_ref.at[pl.ds(start, size)],
                sem,
            )
            cp.start()
            cp.wait()


@functools.partial(jax.jit, static_argnames=("seq_len",))
def _abs_pos_emb_prefix(emb_weight, *, seq_len):
    max_seq_len, dim = emb_weight.shape
    assert seq_len <= max_seq_len, "sequence length exceeds max_seq_len"
    itemsize = jnp.dtype(emb_weight.dtype).itemsize
    total_bytes = seq_len * dim * itemsize
    align = _sublane_align(emb_weight.dtype)

    # Split into 2 chunks when the copy is big enough, so with
    # dimension_semantics=("parallel",) both v7x TensorCores each drive their
    # own DMA engine; on 1-TC chips (v5e/v6e) it is just two back-to-back DMAs.
    if total_bytes >= (1 << 20):
        half = min(_round_up(pl.cdiv(seq_len, 2), align), seq_len)
        chunks = tuple((s, n) for s, n in ((0, half), (half, seq_len - half))
                       if n > 0)
    else:
        chunks = ((0, seq_len),)

    kernel = functools.partial(_copy_prefix_kernel, chunks=chunks)
    return pl.pallas_call(
        kernel,
        out_shape=jax.ShapeDtypeStruct((seq_len, dim), emb_weight.dtype),
        grid=(len(chunks),),
        in_specs=[pl.BlockSpec(memory_space=pl.ANY)],
        out_specs=pl.BlockSpec(memory_space=pl.ANY),
        scratch_shapes=[pltpu.SemaphoreType.DMA(())],
        compiler_params=pltpu.CompilerParams(
            dimension_semantics=("parallel",)),
        cost_estimate=pl.CostEstimate(
            flops=0, transcendentals=0, bytes_accessed=2 * total_bytes),
    )(emb_weight)


def absolute_positional_embedding(x, emb_weight, *, min_pallas_bytes=1 << 20):
    """Forward of AbsolutePositionalEmbedding.

    x:          (B, N, ...) -- only x.shape[1] is used (as in PyTorch forward).
    emb_weight: (max_seq_len, dim) embedding table.
    Returns:    (1, N, dim) == emb_weight[:N][None, :, :]
    """
    n = x.shape[1]
    max_seq_len, dim = emb_weight.shape
    assert n <= max_seq_len, "sequence length exceeds max_seq_len"
    if n * dim * jnp.dtype(emb_weight.dtype).itemsize < min_pallas_bytes:
        # Tiny copy: fixed pallas_call launch overhead dominates; plain slice.
        return emb_weight[:n][None, :, :]
    return _abs_pos_emb_prefix(emb_weight, seq_len=n)[None, :, :]


# ---------------------------------------------------------------------------
# Fused consumer: x + emb_weight[:N]  (removes the redundant HBM round-trip)
# ---------------------------------------------------------------------------

def _add_pos_emb_kernel(x_ref, emb_ref, o_ref):
    # x block (1, tn, D), emb block (tn, D) -> broadcast add, lane-dense store.
    o_ref[...] = x_ref[...] + emb_ref[...].astype(x_ref.dtype)


@functools.partial(jax.jit, static_argnames=("tile_n",))
def add_absolute_positional_embedding(x, emb_weight, *, tile_n=1024):
    """x + AbsolutePositionalEmbedding(x): the usual consumer, fused."""
    B, N, D = x.shape
    max_seq_len, dim = emb_weight.shape
    assert dim == D and N <= max_seq_len
    itemsize = jnp.dtype(x.dtype).itemsize
    align = _sublane_align(x.dtype)

    # VMEM budget: (x-in + emb-in + out) blocks, double buffered
    #   ~ 6 * tn * D * itemsize.  Keep under ~8 MiB so it fits every
    # generation's default scoped VMEM (v5e 16 MiB, v6e/v7x 32 MiB).
    budget = 8 << 20
    tn_budget = max(align, (budget // (6 * D * itemsize)) // align * align)
    tn = min(_round_up(N, align), _round_up(tile_n, align), tn_budget)

    grid = (pl.cdiv(N, tn), B)  # emb block constant across inner b loop
    return pl.pallas_call(
        _add_pos_emb_kernel,
        out_shape=jax.ShapeDtypeStruct((B, N, D), x.dtype),
        grid=grid,
        in_specs=[
            pl.BlockSpec((1, tn, D), lambda i, b: (b, i, 0)),
            pl.BlockSpec((tn, D), lambda i, b: (i, 0)),
        ],
        out_specs=pl.BlockSpec((1, tn, D), lambda i, b: (b, i, 0)),
        compiler_params=pltpu.CompilerParams(
            dimension_semantics=("parallel", "parallel")),
        cost_estimate=pl.CostEstimate(
            flops=B * N * D,
            transcendentals=0,
            bytes_accessed=(2 * B * N * D + N * D) * itemsize),
    )(x, emb_weight)


# ---------------------------------------------------------------------------

def _init_embedding(key, max_seq_len, dim, dtype=jnp.float32):
    # Mimics init_(): nn.init.normal_(weight, std=0.02)
    return 0.02 * jax.random.normal(key, (max_seq_len, dim), dtype)


if __name__ == "__main__":
    key = jax.random.PRNGKey(0)
    k1, k2, k3, k4 = jax.random.split(key, 4)

    # --- Case 1: tiny sequence -> small-N bypass path -----------------------
    emb_small = _init_embedding(k1, 64, 128)
    x_small = jax.random.normal(k2, (2, 8, 128), jnp.float32)
    out_small = absolute_positional_embedding(x_small, emb_small)
    jax.block_until_ready(out_small)
    assert out_small.shape == (1, 8, 128)
    assert jnp.array_equal(out_small, emb_small[:8][None, :, :])

    # --- Case 2: larger sequence -> Pallas HBM->HBM DMA kernel (2 chunks) ---
    emb_big = _init_embedding(k3, 2048, 256)
    x_big = jax.random.normal(k4, (2, 1536, 256), jnp.float32)
    out_big = absolute_positional_embedding(x_big, emb_big)
    jax.block_until_ready(out_big)
    assert out_big.shape == (1, 1536, 256)
    assert jnp.array_equal(out_big, emb_big[:1536][None, :, :])

    # --- Case 3: ragged N, force the kernel path (1 chunk) ------------------
    x_rag = jax.random.normal(k4, (2, 777, 256), jnp.float32)
    out_rag = absolute_positional_embedding(x_rag, emb_big, min_pallas_bytes=0)
    jax.block_until_ready(out_rag)
    assert out_rag.shape == (1, 777, 256)
    assert jnp.array_equal(out_rag, emb_big[:777][None, :, :])

    # --- Case 4: fused consumer (x + pos_emb) --------------------------------
    out_fused = add_absolute_positional_embedding(x_rag, emb_big)
    jax.block_until_ready(out_fused)
    ref_fused = x_rag + emb_big[:777][None, :, :]
    assert out_fused.shape == (2, 777, 256)
    assert jnp.allclose(out_fused, ref_fused, atol=1e-6, rtol=1e-6)

    print("KERNEL_OK")
</pallas_src>

<mosaic_0001>
module attributes {stable_mosaic.version = 11 : i64} {
  func.func @_copy_prefix_kernel(%arg0: i32, %arg1: memref<2048x256xf32, #tpu.memory_space<any>>, %arg2: memref<1536x256xf32, #tpu.memory_space<any>>, %arg3: memref<!tpu.dma_semaphore, #tpu.memory_space<semaphore_mem>>) attributes {dimension_semantics = [#tpu.dimension_semantics<parallel>], iteration_bounds = array<i64: 2>, scalar_prefetch = 0 : i64, scratch_operands = 1 : i64, tpu.core_type = #tpu.core_type<tc>, window_params = [{}, {}]} {
    %c0_i32 = arith.constant 0 : i32
    %0 = arith.cmpi eq, %arg0, %c0_i32 : i32
    %1 = arith.extui %0 : i1 to i32
    %c0_i32_0 = arith.constant 0 : i32
    %2 = arith.cmpi ne, %1, %c0_i32_0 : i32
    scf.if %2 {
      %c0_i32_2 = arith.constant 0 : i32
      %c0_i32_3 = arith.constant 0 : i32
      %6 = tpu.memref_slice %arg1[%c0_i32_2, %c0_i32_3] : memref<2048x256xf32, #tpu.memory_space<any>> -> memref<768x256xf32, #tpu.memory_space<any>>
      %c0_i32_4 = arith.constant 0 : i32
      %c0_i32_5 = arith.constant 0 : i32
      %7 = tpu.memref_slice %arg2[%c0_i32_4, %c0_i32_5] : memref<1536x256xf32, #tpu.memory_space<any>> -> memref<768x256xf32, #tpu.memory_space<any>>
      tpu.enqueue_dma source(%6 : memref<768x256xf32, #tpu.memory_space<any>>) target(%7 : memref<768x256xf32, #tpu.memory_space<any>>) target_semaphore(%arg3 : memref<!tpu.dma_semaphore, #tpu.memory_space<semaphore_mem>>)
      %c0_i32_6 = arith.constant 0 : i32
      %c0_i32_7 = arith.constant 0 : i32
      %8 = tpu.memref_slice %arg1[%c0_i32_6, %c0_i32_7] : memref<2048x256xf32, #tpu.memory_space<any>> -> memref<768x256xf32, #tpu.memory_space<any>>
      %c0_i32_8 = arith.constant 0 : i32
      %c0_i32_9 = arith.constant 0 : i32
      %9 = tpu.memref_slice %arg2[%c0_i32_8, %c0_i32_9] : memref<1536x256xf32, #tpu.memory_space<any>> -> memref<768x256xf32, #tpu.memory_space<any>>
      tpu.wait_dma2 semaphore(%arg3 : memref<!tpu.dma_semaphore, #tpu.memory_space<semaphore_mem>>) src(%8 : memref<768x256xf32, #tpu.memory_space<any>>) dst(%9 : memref<768x256xf32, #tpu.memory_space<any>>)
    } else {
    }
    %c1_i32 = arith.constant 1 : i32
    %3 = arith.cmpi eq, %arg0, %c1_i32 : i32
    %4 = arith.extui %3 : i1 to i32
    %c0_i32_1 = arith.constant 0 : i32
    %5 = arith.cmpi ne, %4, %c0_i32_1 : i32
    scf.if %5 {
      %c768_i32 = arith.constant 768 : i32
      %c0_i32_2 = arith.constant 0 : i32
      %6 = tpu.memref_slice %arg1[%c768_i32, %c0_i32_2] : memref<2048x256xf32, #tpu.memory_space<any>> -> memref<768x256xf32, #tpu.memory_space<any>>
      %c768_i32_3 = arith.constant 768 : i32
      %c0_i32_4 = arith.constant 0 : i32
      %7 = tpu.memref_slice %arg2[%c768_i32_3, %c0_i32_4] : memref<1536x256xf32, #tpu.memory_space<any>> -> memref<768x256xf32, #tpu.memory_space<any>>
      tpu.enqueue_dma source(%6 : memref<768x256xf32, #tpu.memory_space<any>>) target(%7 : memref<768x256xf32, #tpu.memory_space<any>>) target_semaphore(%arg3 : memref<!tpu.dma_semaphore, #tpu.memory_space<semaphore_mem>>)
      %c768_i32_5 = arith.constant 768 : i32
      %c0_i32_6 = arith.constant 0 : i32
      %8 = tpu.memref_slice %arg1[%c768_i32_5, %c0_i32_6] : memref<2048x256xf32, #tpu.memory_space<any>> -> memref<768x256xf32, #tpu.memory_space<any>>
      %c768_i32_7 = arith.constant 768 : i32
      %c0_i32_8 = arith.constant 0 : i32
      %9 = tpu.memref_slice %arg2[%c768_i32_7, %c0_i32_8] : memref<1536x256xf32, #tpu.memory_space<any>> -> memref<768x256xf32, #tpu.memory_space<any>>
      tpu.wait_dma2 semaphore(%arg3 : memref<!tpu.dma_semaphore, #tpu.memory_space<semaphore_mem>>) src(%8 : memref<768x256xf32, #tpu.memory_space<any>>) dst(%9 : memref<768x256xf32, #tpu.memory_space<any>>)
    } else {
    }
    return
  }
}

</mosaic_0001>

<bundles_post_ra>
// kernel: _abs_pos_emb_prefix.1
= control target key start
LH: loop header
LB: loop body
LE: loop exit
PB: predicated region body
PF: predicated region fallthrough
CT: control target
= control target key end

     0   :  { %s103_s6 = smov 0   ;;  %s133_s0 = inlined_call_operand.hbm [shape: f32[2048,256], index: 0, kind: input, shape index: {}]   ;;  %s134_s1 = inlined_call_operand.hbm [shape: f32[1536,256], index: 1, kind: output, shape index: {}]  }
   0x1 LB: > { %p77_p0 = scmp.eq.s32.totalorder %s105_s6, 0  ;;  %s107_s7 = smov [#allocation2]   ;;  %s105_s6 = sphi %s103_s6, %s11_s6  }
   0x2   : > { %s108_s8 = smov [#allocation3]   ;;  %s109_s9 = smov 0  }
   0x3   : > { %72 = dma.general (%p77_p0), %s133_s0, 24576, %s134_s1, %s107_s7, %s108_s8, [#allocation4], %s109_s9, 0  }
   0x4   : > { %96 = dma.done.wait (%p77_p0), [#allocation2], 24576 }
   0x5   : > { %98 = vsyncadd (%p77_p0), [#allocation2], 4294942720  ;;  %p78_p1 = scmp.eq.s32.totalorder %s105_s6, 1  ;;  %s38_s16 = scalar_lea.hbm %s133_s0, 24576 }
   0x6   : > { %s39_s19 = scalar_lea.hbm %s134_s1, 24576  ;;  %s110_s20 = smov [#allocation5]  }
   0x7   : > { %75 = dma.general (%p78_p1), %s38_s16, 24576, %s39_s19, %s107_s7, %s110_s20, [#allocation6], %s109_s9, 0  }
   0x8   : > { %100 = dma.done.wait (%p78_p1), [#allocation2], 24576 }
   0x9   : > { %102 = vsyncadd (%p78_p1), [#allocation2], 4294942720  ;;  %s11_s6 = sadd.s32 1, %s105_s6  }
   0xa   : > { %p8_p2 = scmp.ge.s32.totalorder %s11_s6, 2  }
   0xc   :  { %10 = sbr.rel (!%p8_p2) target bundleno = 1 (0x1), region = 29 }
  0x13   :  { %57 = vsyncmov [#allocation2] }
  0x16   :  { %s58_s21 = vpop.sfrf %57 }
  0x17   :  { %p70_p3 = scmp.ne.s32.totalorder %s58_s21, 0 }
  0x19   :  { %62 = shalt.err (%p70_p3)  }

</bundles_post_ra>
